<compile_context>
chip_gen: v7x
topology: tpu7x:2x2x1
jax: 0.10.0
libtpu: 0.0.40
codegen_flags: <defaults>
</compile_context>

<pallas_src>
import functools

import jax
import jax.numpy as jnp
import numpy as np
from jax import lax
from jax.experimental import pallas as pl
from jax.experimental.pallas import tpu as pltpu


def _round_up(v, m):
    return (v + m - 1) // m * m


def _linear_kernel(*refs, norm, bias):
    # refs = (x, w, [b], out, acc, nrm)
    if bias:
        x_ref, w_ref, b_ref = refs[:3]
        o_ref, acc_ref, nrm_ref = refs[3:]
    else:
        x_ref, w_ref = refs[:2]
        o_ref, acc_ref, nrm_ref = refs[2:]
        b_ref = None

    k = pl.program_id(2)

    @pl.when(k == 0)
    def _init():
        acc_ref[...] = jnp.zeros_like(acc_ref)
        if norm:
            nrm_ref[...] = jnp.zeros_like(nrm_ref)

    x = x_ref[...]                                     # (tm, tk)
    # Contract last axis of both operands: (tm, tk) . (tn, tk) -> (tm, tn).
    # No transpose / relayout; the MXU consumes the K-major weight directly.
    acc_ref[...] += lax.dot_general(
        x, w_ref[...],
        dimension_numbers=(((1,), (1,)), ((), ())),
        preferred_element_type=jnp.float32)

    if norm:
        xf = x.astype(jnp.float32)                     # f32 reduction math
        nrm_ref[...] += jnp.sum(xf * xf, axis=-1, keepdims=True)

    @pl.when(k == pl.num_programs(2) - 1)
    def _finalize():
        y = acc_ref[...]
        if norm:
            # y / ||x||_2 == y * rsqrt(sum(x^2)) -> EUP slot, f32.
            y = y * lax.rsqrt(nrm_ref[...])
        if bias:
            y = y + b_ref[...].astype(jnp.float32)
        o_ref[...] = y.astype(o_ref.dtype)


def pallas_linear(x, w, b=None, *, norm=True, bias=True,
                  compute_dtype=jnp.bfloat16, tm=256, tn=256, tk=512):
    """querypose Linear forward.

    x: (M, K) f32, w: (N, K) f32 (PyTorch nn.Linear layout), b: (N,) f32.
    Returns (M, N) f32.
    NOTE: implements the 2-D case (torch.norm(x, dim=1) == L2 over features),
    which is how this head uses the module.
    """
    assert x.ndim == 2 and w.ndim == 2 and x.shape[1] == w.shape[1]
    if bias:
        assert b is not None
    m, k = x.shape
    n = w.shape[0]

    # Tile sizes: sublane dims multiples of 8, lane dims multiples of 128.
    tm = min(_round_up(m, 8), tm)
    tn = min(_round_up(n, 128), tn)
    tk = min(_round_up(k, 128), tk)
    mp, np_, kp = _round_up(m, tm), _round_up(n, tn), _round_up(k, tk)

    # Zero-pad to tile multiples.  K-padding is exact for both the matmul and
    # the x-norm; padded rows/cols are sliced off below.  Padding N to >=128
    # keeps the output stores lane-dense (no masked vst).
    xp = jnp.zeros((mp, kp), compute_dtype).at[:m, :k].set(x.astype(compute_dtype))
    wp = jnp.zeros((np_, kp), compute_dtype).at[:n, :k].set(w.astype(compute_dtype))

    in_specs = [
        pl.BlockSpec((tm, tk), lambda i, j, kk: (i, kk)),
        pl.BlockSpec((tn, tk), lambda i, j, kk: (j, kk)),
    ]
    args = [xp, wp]
    if bias:
        bp = jnp.zeros((1, np_), jnp.float32).at[0, :n].set(b.astype(jnp.float32))
        in_specs.append(pl.BlockSpec((1, tn), lambda i, j, kk: (0, j)))
        args.append(bp)

    out = pl.pallas_call(
        functools.partial(_linear_kernel, norm=norm, bias=bias),
        grid=(mp // tm, np_ // tn, kp // tk),
        in_specs=in_specs,
        out_specs=pl.BlockSpec((tm, tn), lambda i, j, kk: (i, j)),
        out_shape=jax.ShapeDtypeStruct((mp, np_), jnp.float32),
        scratch_shapes=[
            pltpu.VMEM((tm, tn), jnp.float32),   # f32 matmul accumulator
            pltpu.VMEM((tm, 1), jnp.float32),    # running sum(x^2) per row
        ],
        compiler_params=pltpu.CompilerParams(
            dimension_semantics=("parallel", "parallel", "arbitrary")),
    )(*args)
    return out[:m, :n]


def _reference(x, w, b=None, norm=True, bias=True):
    y = x @ w.T
    if norm:
        y = y / jnp.linalg.norm(x, axis=1, keepdims=True)
    if bias:
        y = y + b
    return y


if __name__ == "__main__":
    key = jax.random.PRNGKey(0)
    k1, k2, k3, k4, k5, k6 = jax.random.split(key, 6)

    # --- small shapes implied by the module: (batch, in_ch) x (out_ch, in_ch)
    M, K, N = 8, 32, 16
    x = jax.random.normal(k1, (M, K), jnp.float32)
    limit = 0.01 * (6.0 / (K + N)) ** 0.5          # xavier_uniform_, gain=0.01
    w = jax.random.uniform(k2, (N, K), jnp.float32, -limit, limit)
    b = 0.1 * jax.random.normal(k3, (N,), jnp.float32)

    fwd = jax.jit(functools.partial(pallas_linear, norm=True, bias=True))
    y = fwd(x, w, b)
    jax.block_until_ready(y)
    np.testing.assert_allclose(np.asarray(y), np.asarray(_reference(x, w, b)),
                               rtol=2e-2, atol=1e-3)

    # --- norm=False / bias=False path (no zeros-bias materialized)
    fwd_nb = jax.jit(functools.partial(pallas_linear, norm=False, bias=False))
    y_nb = fwd_nb(x, w)
    jax.block_until_ready(y_nb)
    np.testing.assert_allclose(
        np.asarray(y_nb),
        np.asarray(_reference(x, w, norm=False, bias=False)),
        rtol=2e-2, atol=1e-3)

    # --- non-aligned shapes with a multi-step (M, N, K) grid: exercises the
    #     f32 accumulator, the K-tiled norm accumulation, padding and slicing.
    M2, K2, N2 = 40, 300, 200
    x2 = jax.random.normal(k4, (M2, K2), jnp.float32)
    lim2 = 0.01 * (6.0 / (K2 + N2)) ** 0.5
    w2 = jax.random.uniform(k5, (N2, K2), jnp.float32, -lim2, lim2)
    b2 = 0.1 * jax.random.normal(k6, (N2,), jnp.float32)

    fwd2 = jax.jit(functools.partial(pallas_linear, norm=True, bias=True,
                                     tm=8, tn=128, tk=128))
    y2 = fwd2(x2, w2, b2)
    jax.block_until_ready(y2)
    np.testing.assert_allclose(np.asarray(y2), np.asarray(_reference(x2, w2, b2)),
                               rtol=2e-2, atol=1e-3)

    print("KERNEL_OK")
</pallas_src>

<mosaic_0001>
module attributes {stable_mosaic.version = 11 : i64} {
  func.func @_linear_kernel(%arg0: i32, %arg1: i32, %arg2: i32, %arg3: memref<8x128xbf16, #tpu.memory_space<vmem>>, %arg4: memref<128x128xbf16, #tpu.memory_space<vmem>>, %arg5: memref<1x128xf32, #tpu.memory_space<vmem>>, %arg6: memref<8x128xf32, #tpu.memory_space<vmem>>, %arg7: memref<8x128xf32, #tpu.memory_space<vmem>>, %arg8: memref<8x1xf32, #tpu.memory_space<vmem>>) attributes {dimension_semantics = [#tpu.dimension_semantics<parallel>, #tpu.dimension_semantics<parallel>, #tpu.dimension_semantics<arbitrary>], iteration_bounds = array<i64: 1, 1, 1>, scalar_prefetch = 0 : i64, scratch_operands = 2 : i64, tpu.core_type = #tpu.core_type<tc>, window_params = [{transform_indices = @transform_0, window_bounds = array<i64: 8, 128>}, {transform_indices = @transform_1, window_bounds = array<i64: 128, 128>}, {transform_indices = @transform_2, window_bounds = array<i64: 1, 128>}, {transform_indices = @transform_3, window_bounds = array<i64: 8, 128>}]} {
    %c0_i32 = arith.constant 0 : i32
    %0 = arith.cmpi eq, %arg2, %c0_i32 : i32
    %1 = arith.extui %0 : i1 to i32
    %c0_i32_0 = arith.constant 0 : i32
    %2 = arith.cmpi ne, %1, %c0_i32_0 : i32
    scf.if %2 {
      %cst_15 = arith.constant 0.000000e+00 : f32
      %19 = vector.broadcast %cst_15 : f32 to vector<8x128xf32>
      %c0_16 = arith.constant 0 : index
      %c0_17 = arith.constant 0 : index
      %20 = vector.load %arg7[%c0_16, %c0_17] : memref<8x128xf32, #tpu.memory_space<vmem>>, vector<8x128xf32>
      tpu.vector_store %arg7[%c0_16, %c0_17], %19 {strides = array<i32>} : memref<8x128xf32, #tpu.memory_space<vmem>>, vector<8x128xf32>,
      %cst_18 = arith.constant 0.000000e+00 : f32
      %21 = vector.broadcast %cst_18 : f32 to vector<8x1xf32>
      %c0_19 = arith.constant 0 : index
      %c0_20 = arith.constant 0 : index
      %22 = vector.load %arg8[%c0_19, %c0_20] : memref<8x1xf32, #tpu.memory_space<vmem>>, vector<8x1xf32>
      tpu.vector_store %arg8[%c0_19, %c0_20], %21 {strides = array<i32>} : memref<8x1xf32, #tpu.memory_space<vmem>>, vector<8x1xf32>,
    } else {
    }
    %c0 = arith.constant 0 : index
    %c0_1 = arith.constant 0 : index
    %3 = vector.load %arg3[%c0, %c0_1] : memref<8x128xbf16, #tpu.memory_space<vmem>>, vector<8x128xbf16>
    %c0_2 = arith.constant 0 : index
    %c0_3 = arith.constant 0 : index
    %4 = vector.load %arg7[%c0_2, %c0_3] : memref<8x128xf32, #tpu.memory_space<vmem>>, vector<8x128xf32>
    %c0_4 = arith.constant 0 : index
    %c0_5 = arith.constant 0 : index
    %5 = vector.load %arg4[%c0_4, %c0_5] : memref<128x128xbf16, #tpu.memory_space<vmem>>, vector<128x128xbf16>
    %cst = arith.constant dense<0.000000e+00> : vector<8x128xf32>
    %6 = tpu.matmul %3, %5, %cst {dimension_numbers = #tpu.dot_dimension_numbers<[1], [1], [0], [0], [0, 0, 1, 0], [], []>} : vector<8x128xbf16>, vector<128x128xbf16>, vector<8x128xf32> -> vector<8x128xf32>
    %7 = arith.addf %4, %6 : vector<8x128xf32>
    %c0_6 = arith.constant 0 : index
    %c0_7 = arith.constant 0 : index
    %8 = vector.load %arg7[%c0_6, %c0_7] : memref<8x128xf32, #tpu.memory_space<vmem>>, vector<8x128xf32>
    tpu.vector_store %arg7[%c0_6, %c0_7], %7 {strides = array<i32>} : memref<8x128xf32, #tpu.memory_space<vmem>>, vector<8x128xf32>,
    %9 = arith.extf %3 : vector<8x128xbf16> to vector<8x128xf32>
    %c0_8 = arith.constant 0 : index
    %c0_9 = arith.constant 0 : index
    %10 = vector.load %arg8[%c0_8, %c0_9] : memref<8x1xf32, #tpu.memory_space<vmem>>, vector<8x1xf32>
    %11 = arith.mulf %9, %9 : vector<8x128xf32>
    %cst_10 = arith.constant dense<0.000000e+00> : vector<8xf32>
    %12 = vector.multi_reduction <add>, %11, %cst_10 [1] : vector<8x128xf32> to vector<8xf32>
    %13 = vector.shape_cast %12 : vector<8xf32> to vector<8x1xf32>
    %14 = arith.addf %10, %13 : vector<8x1xf32>
    %c0_11 = arith.constant 0 : index
    %c0_12 = arith.constant 0 : index
    %15 = vector.load %arg8[%c0_11, %c0_12] : memref<8x1xf32, #tpu.memory_space<vmem>>, vector<8x1xf32>
    tpu.vector_store %arg8[%c0_11, %c0_12], %14 {strides = array<i32>} : memref<8x1xf32, #tpu.memory_space<vmem>>, vector<8x1xf32>,
    %c0_i32_13 = arith.constant 0 : i32
    %16 = arith.cmpi eq, %arg2, %c0_i32_13 : i32
    %17 = arith.extui %16 : i1 to i32
    %c0_i32_14 = arith.constant 0 : i32
    %18 = arith.cmpi ne, %17, %c0_i32_14 : i32
    scf.if %18 {
      %c0_15 = arith.constant 0 : index
      %c0_16 = arith.constant 0 : index
      %19 = vector.load %arg7[%c0_15, %c0_16] : memref<8x128xf32, #tpu.memory_space<vmem>>, vector<8x128xf32>
      %c0_17 = arith.constant 0 : index
      %c0_18 = arith.constant 0 : index
      %20 = vector.load %arg8[%c0_17, %c0_18] : memref<8x1xf32, #tpu.memory_space<vmem>>, vector<8x1xf32>
      %21 = math.rsqrt %20 : vector<8x1xf32>
      %22 = vector.broadcast %21 : vector<8x1xf32> to vector<8x128xf32>
      %23 = arith.mulf %19, %22 : vector<8x128xf32>
      %c0_19 = arith.constant 0 : index
      %c0_20 = arith.constant 0 : index
      %24 = vector.load %arg5[%c0_19, %c0_20] : memref<1x128xf32, #tpu.memory_space<vmem>>, vector<1x128xf32>
      %25 = vector.broadcast %24 : vector<1x128xf32> to vector<8x128xf32>
      %26 = arith.addf %23, %25 : vector<8x128xf32>
      %c0_21 = arith.constant 0 : index
      %c0_22 = arith.constant 0 : index
      %27 = vector.load %arg6[%c0_21, %c0_22] : memref<8x128xf32, #tpu.memory_space<vmem>>, vector<8x128xf32>
      tpu.vector_store %arg6[%c0_21, %c0_22], %26 {strides = array<i32>} : memref<8x128xf32, #tpu.memory_space<vmem>>, vector<8x128xf32>,
    } else {
    }
    return
  }
  func.func @transform_0(%arg0: i32, %arg1: i32, %arg2: i32) -> (i32, i32) {
    %c0_i32 = arith.constant 0 : i32
    return %arg0, %arg2 : i32, i32
  }
  func.func @transform_1(%arg0: i32, %arg1: i32, %arg2: i32) -> (i32, i32) {
    %c0_i32 = arith.constant 0 : i32
    return %arg1, %arg2 : i32, i32
  }
  func.func @transform_2(%arg0: i32, %arg1: i32, %arg2: i32) -> (i32, i32) {
    %c0_i32 = arith.constant 0 : i32
    %c0_i32_0 = arith.constant 0 : i32
    return %c0_i32, %arg1 : i32, i32
  }
  func.func @transform_3(%arg0: i32, %arg1: i32, %arg2: i32) -> (i32, i32) {
    %c0_i32 = arith.constant 0 : i32
    return %arg0, %arg1 : i32, i32
  }
}

</mosaic_0001>

<bundles_post_ra>
// kernel: pallas_linear.1
= control target key start
LH: loop header
LB: loop body
LE: loop exit
PB: predicated region body
PF: predicated region fallthrough
CT: control target
= control target key end

     0   :  { %v251_v3 = vmov 0.0   ;;  %vm252_vm0 = vmmov 0   ;;  %s319_s0 = inlined_call_operand.vmem [shape: bf16[8,128], index: 0, kind: input, shape index: {}]   ;;  %s320_s1 = inlined_call_operand.vmem [shape: bf16[128,128], index: 1, kind: input, shape index: {}]   ;;  %s321_s2 = inlined_call_operand.vmem [shape: f32[1,128], index: 2, kind: input, shape index: {}]   ;;  %s322_s3 = inlined_call_operand.hbm [shape: f32[8,128], index: 3, kind: output, shape index: {}]  }
   0x1   :  { %v23_v0 = vld [vmem:[%s319_s0] sm:$0xf]  ;;  %192 = vmatprep.subr.bf16.mxu0 %v251_v3  ;;  %208 = vmatprep.mubr.msk.bf16.mxu0 %vm252_vm0, %v251_v3  ;;  %v218_v5 = vld [vmem:[%s320_s1 + $0x8] sm:$0xff]  }
   0x2   :  { %v217_v1 = vld [vmem:[%s320_s1] sm:$0xff]   ;;  %v131_v2 = vunpack.c.l.bf16 %v23_v0 }
   0x3   :  { %193 = vmatpush3.bf16.xpose.msra.mxu0 %v217_v1 }
   0x4   :  { %v133_v4 = vmul.f32 %v131_v2, %v131_v2  ;;  %194 = vmatprep.subr.bf16.mxu0 %v251_v3 }
   0x6   :  { %134 = vadd.xlane.f32.xlu0 %v133_v4 }
   0x7   :  { %8 = vsyncpa [#allocation5], 0  ;;  %vm21_vm1 = vcmask 7168   ;;  %v219_v6 = vld [vmem:[%s320_s1 + $0x10] sm:$0xff]   ;;  %v220_v7 = vld [vmem:[%s320_s1 + $0x18] sm:$0xff]   ;;  %v253_v8 = vmov 0  }
   0x8   :  { %22 = vst.msk [vmem:[#allocation3] sm:$0xff] %vm21_vm1, %v251_v3  ;;  %216 = vset.pattern.permute.xlu0 %v253_v8  ;;  %v221_v9 = vld [vmem:[%s320_s1 + $0x20] sm:$0xff]   ;;  %v222_v10 = vld [vmem:[%s320_s1 + $0x28] sm:$0xff]   ;;  %v223_v11 = vld [vmem:[%s320_s1 + $0x30] sm:$0xff]  }
   0x9   :  { %v224_v12 = vld [vmem:[%s320_s1 + $0x38] sm:$0xff]   ;;  %v182_v23 = vld [vmem:[%s321_s2] ss:$0 sm:$0xff]  ;;  %s254_s1 = smov [#allocation4]  }
   0xa   :  { %s166_s4 = sshll.u32 %s254_s1, 4  ;;  %s167_s4 = int_to_ptr.vmem [resolvable:$true] %s166_s4 }
   0xb   :  { %195 = vmatpush3.bf16.xpose.msra.mxu0 %v218_v5  ;;  %s227_s5 = scalar_lea.vmem %s167_s4, 128  ;;  %p232_p1 = scmp.lt.s32.totalorder %s167_s4, %s167_s4 }
   0xc   :  { %196 = vmatprep.subr.bf16.mxu0 %v251_v3  ;;  %p228_p0 = scmp.ne.s32.totalorder %s167_s4, %s227_s5  ;;  %p233_p2 = scmp.lt.s32.totalorder %s227_s5, %s227_s5 }
   0xe   :  { %p234_p3 = por %p233_p2, %p232_p1 }
   0xf   :  { %v132_v13 = vld [vmem:[#allocation3] sm:$0xff] }
  0x10   :  { %p235_p4 = pnand %p234_p3, %p228_p0 }
  0x13   :  { %197 = vmatpush3.bf16.xpose.msra.mxu0 %v219_v6 }
  0x14   :  { %198 = vmatprep.subr.bf16.mxu0 %v251_v3 }
  0x1b   :  { %199 = vmatpush3.bf16.xpose.msra.mxu0 %v220_v7 }
  0x1c   :  { %200 = vmatprep.subr.bf16.mxu0 %v251_v3 }
  0x23   :  { %201 = vmatpush3.bf16.xpose.msra.mxu0 %v221_v9 }
  0x24   :  { %202 = vmatprep.subr.bf16.mxu0 %v251_v3 }
  0x2b   :  { %203 = vmatpush3.bf16.xpose.msra.mxu0 %v222_v10 }
  0x2c   :  { %204 = vmatprep.subr.bf16.mxu0 %v251_v3 }
  0x33   :  { %205 = vmatpush3.bf16.xpose.msra.mxu0 %v223_v11 }
  0x34   :  { %206 = vmatprep.subr.bf16.mxu0 %v251_v3 }
  0x3b   :  { %207 = vmatpush3.bf16.xpose.msra.mxu0 %v224_v12 }
  0x42   :  { %209 = vmatmul.mubr.bf16.vlgmr.msra.gmra.mrb[0].mxu0 %v23_v0 }
  0x93   :  { %v135_v14 = vpop.xlane.xlu0 %134 }
  0x94   :  { %v136_v15 = vadd.f32 %v135_v14, %v132_v13 }
  0x96   :  { %138 = vst.msk [vmem:[#allocation3] sm:$0xff] %vm21_vm1, %v136_v15 }
  0x9d   :  { %v143_v16 = vld [vmem:[#allocation3] sm:$0xff] }
  0x9e   :  { %225 = vrsqrt.f32 %v143_v16 }
  0xa8   :  { %v226_v17 = vpop.eup %225 }
  0xa9   :  { %147 = vperm.xlu0 %216, %v226_v17  }
 0x115   :  { %v123_v18 = vpop.f32.mrb[0].mxu0 }
 0x116   :  { %v210_v19 = vpop.f32.mrb[1].mxu0 }
 0x117   :  { %v126_v20 = vpop.f32.mrb[2].mxu0 }
 0x118   :  { %v211_v21 = vpop.f32.mrb[3].mxu0 }
 0x128   :  { %v148_v22 = vpop.permute.xlu0 %147 }
 0x129   :  { %v150_v24 = vmul.f32 %v148_v22, %v123_v18 }
 0x12b   :  { %v158_v25 = vadd.f32 %v182_v23, %v150_v24 }
 0x12d   :  { %159 = vst [vmem:[#allocation4] sm:$0xff] %v158_v25 }
 0x12e   :  { %238 = shalt.err (!%p235_p4)
}
 0x12f   :  { %s239_s8 = scalar_lea.hbm %s322_s3, 128 }
 0x130   :  { %p240_p5 = scmp.ne.s32.totalorder %s322_s3, %s239_s8  ;;  %p243_p6 = scmp.lt.u32.totalorder %s239_s8, %s322_s3 }
 0x132   :  { %p245_p7 = pnand %p243_p6, %p240_p5 }
 0x134   :  { %248 = shalt.err (!%p245_p7)
}
 0x135   :  { %169 = dma.vmem_to_hbm [thread:$0]  %s167_s4, 128, %s322_s3, [#allocation5]  }
 0x136   :  { %249 = dma.done.wait [#allocation5], 128  }
 0x137   :  { %250 = vsyncadd [#allocation5], 4294967168 }
 0x138   :  { %173 = vsyncpa [#allocation5], 1 }

</bundles_post_ra>
